<compile_context>
chip_gen: v7x
topology: tpu7x:2x2x1
jax: 0.10.0
libtpu: 0.0.40
codegen_flags: <defaults>
</compile_context>

<pallas_src>
import math

import jax
import jax.numpy as jnp
from jax.experimental import pallas as pl
from jax.experimental.pallas import tpu as pltpu


def _heads_kernel(x_ref, w_ref, b_ref, out_ref):
    # x_ref:   (1, C, T)      channel-major pixel tile of one sample
    # w_ref:   (OUT+1, C)     fused actor+critic 1x1-conv weights
    # b_ref:   (OUT+1, 1)     fused biases (broadcast over the lane/pixel axis)
    # out_ref: (1, OUT+1, T)  lane-dense fused output tile
    x = x_ref[0]                                                   # (C, T)
    out = jnp.dot(w_ref[...], x, preferred_element_type=jnp.float32)
    out_ref[0] = (out + b_ref[...]).astype(out_ref.dtype)


def _pick_hw_tile(hw, target=2048):
    """Largest multiple of 128 <= target that evenly divides hw (else full hw)."""
    if hw % 128 != 0:
        return hw  # full-extent block: always legal w.r.t. the (8,128) rule
    t = max(128, min((target // 128) * 128, hw))
    while hw % t != 0:
        t -= 128
    return t


def actor_critic_heads(x_nchw, wa, ba, wc, bc, *, hw_tile_target=2048):
    """Runs the fused actor/critic 1x1-conv heads of ActorCritic (multi=1).

    Args:
      x_nchw: (N, C, H, W) backbone features (backbone == identity here).
      wa: (OUT, C) actor 1x1-conv weight (torch layout (OUT, C, 1, 1) squeezed).
      ba: (OUT,)   actor bias.
      wc: (1, C)   critic 1x1-conv weight.
      bc: (1,)     critic bias.

    Returns:
      (critic, actor) with shapes (N, 1, H, W) and (N, OUT, H, W) — same
      ordering as the PyTorch module's return value.
    """
    N, C, H, W = x_nchw.shape
    OUT = wa.shape[0]
    OUTP = OUT + 1
    HW = H * W

    # NCHW -> (N, C, HW): contiguous reshape, no transpose / HBM round trip.
    x_mat = x_nchw.reshape(N, C, HW)
    w_cat = jnp.concatenate([wa, wc], axis=0)                      # (OUT+1, C)
    b_cat = jnp.concatenate([ba, bc], axis=0).reshape(OUTP, 1)     # (OUT+1, 1)

    t_hw = _pick_hw_tile(HW, hw_tile_target)
    grid = (N, HW // t_hw)

    itemsize = jnp.dtype(x_mat.dtype).itemsize
    flops = 2 * N * HW * C * OUTP
    bytes_accessed = (
        x_mat.size * itemsize            # dominant: feature-map read
        + N * OUTP * HW * itemsize       # fused output write
        + w_cat.size * itemsize
        + b_cat.size * itemsize
    )

    out = pl.pallas_call(
        _heads_kernel,
        out_shape=jax.ShapeDtypeStruct((N, OUTP, HW), x_mat.dtype),
        grid=grid,
        in_specs=[
            pl.BlockSpec((1, C, t_hw), lambda n, t: (n, 0, t)),
            pl.BlockSpec((OUTP, C), lambda n, t: (0, 0)),
            pl.BlockSpec((OUTP, 1), lambda n, t: (0, 0)),
        ],
        out_specs=pl.BlockSpec((1, OUTP, t_hw), lambda n, t: (n, 0, t)),
        compiler_params=pltpu.CompilerParams(
            dimension_semantics=("parallel", "parallel"),
        ),
        cost_estimate=pl.CostEstimate(
            flops=flops, transcendentals=0, bytes_accessed=bytes_accessed),
    )(x_mat, w_cat, b_cat)

    out = out.reshape(N, OUTP, H, W)
    actor = out[:, :OUT]      # (N, OUT, H, W)
    critic = out[:, OUT:]     # (N, 1,   H, W)
    return critic, actor


def init_params(key, in_ch, out_ch):
    """Deterministic init matching torch Conv2d default (kaiming-uniform-ish)."""
    k_wa, k_ba, k_wc, k_bc = jax.random.split(key, 4)
    fan_in = in_ch  # kernel_size = 1
    bound = 1.0 / math.sqrt(fan_in)
    wa = jax.random.uniform(k_wa, (out_ch, in_ch), jnp.float32, -bound, bound)
    ba = jax.random.uniform(k_ba, (out_ch,), jnp.float32, -bound, bound)
    wc = jax.random.uniform(k_wc, (1, in_ch), jnp.float32, -bound, bound)
    bc = jax.random.uniform(k_bc, (1,), jnp.float32, -bound, bound)
    return wa, ba, wc, bc


if __name__ == "__main__":
    key = jax.random.PRNGKey(0)
    k_x, k_p = jax.random.split(key)

    # ActorCritic(args, features=[32,...], backbone, out_ch=4) with
    # multi=1, lowres=False, lstm_feats=0, noisy=False:
    #   last_feat_ch = features[0] = 32
    N, C, H, W = 2, 32, 16, 16
    OUT_CH = 4

    x = jax.random.normal(k_x, (N, C, H, W), jnp.float32)  # NCHW like PyTorch
    wa, ba, wc, bc = init_params(k_p, C, OUT_CH)

    critic, actor = actor_critic_heads(x, wa, ba, wc, bc)
    jax.block_until_ready((critic, actor))

    # Reference check against plain-JAX 1x1 conv (einsum over channels).
    actor_ref = jnp.einsum("nchw,oc->nohw", x, wa) + ba[None, :, None, None]
    critic_ref = jnp.einsum("nchw,oc->nohw", x, wc) + bc[None, :, None, None]
    assert actor.shape == (N, OUT_CH, H, W)
    assert critic.shape == (N, 1, H, W)
    assert jnp.allclose(actor, actor_ref, atol=1e-4, rtol=1e-4)
    assert jnp.allclose(critic, critic_ref, atol=1e-4, rtol=1e-4)

    print("KERNEL_OK")
</pallas_src>

<mosaic_0001>
module attributes {stable_mosaic.version = 11 : i64} {
  func.func @_heads_kernel(%arg0: i32, %arg1: i32, %arg2: memref<1x32x256xf32, #tpu.memory_space<vmem>>, %arg3: memref<5x32xf32, #tpu.memory_space<vmem>>, %arg4: memref<5x1xf32, #tpu.memory_space<vmem>>, %arg5: memref<1x5x256xf32, #tpu.memory_space<vmem>>) attributes {dimension_semantics = [#tpu.dimension_semantics<parallel>, #tpu.dimension_semantics<parallel>], iteration_bounds = array<i64: 2, 1>, scalar_prefetch = 0 : i64, scratch_operands = 0 : i64, tpu.core_type = #tpu.core_type<tc>, window_params = [{transform_indices = @transform_0, window_bounds = array<i64: 1, 32, 256>}, {pipeline_mode = #tpu.pipeline_mode<synchronous>, transform_indices = @transform_1, window_bounds = array<i64: 5, 32>}, {pipeline_mode = #tpu.pipeline_mode<synchronous>, transform_indices = @transform_2, window_bounds = array<i64: 5, 1>}, {transform_indices = @transform_3, window_bounds = array<i64: 1, 5, 256>}]} {
    %c0 = arith.constant 0 : index
    %c0_0 = arith.constant 0 : index
    %c0_1 = arith.constant 0 : index
    %0 = vector.load %arg2[%c0, %c0_0, %c0_1] : memref<1x32x256xf32, #tpu.memory_space<vmem>>, vector<1x32x256xf32>
    %1 = vector.shape_cast %0 : vector<1x32x256xf32> to vector<32x256xf32>
    %c0_2 = arith.constant 0 : index
    %c0_3 = arith.constant 0 : index
    %2 = vector.load %arg3[%c0_2, %c0_3] : memref<5x32xf32, #tpu.memory_space<vmem>>, vector<5x32xf32>
    %cst = arith.constant dense<0.000000e+00> : vector<5x256xf32>
    %3 = tpu.matmul %2, %1, %cst {dimension_numbers = #tpu.dot_dimension_numbers<[1], [0], [0], [1], [0, 0, 1, 1], [], []>} : vector<5x32xf32>, vector<32x256xf32>, vector<5x256xf32> -> vector<5x256xf32>
    %c0_4 = arith.constant 0 : index
    %c0_5 = arith.constant 0 : index
    %4 = vector.load %arg4[%c0_4, %c0_5] : memref<5x1xf32, #tpu.memory_space<vmem>>, vector<5x1xf32>
    %5 = vector.broadcast %4 : vector<5x1xf32> to vector<5x256xf32>
    %6 = arith.addf %3, %5 : vector<5x256xf32>
    %c0_6 = arith.constant 0 : index
    %c0_7 = arith.constant 0 : index
    %c0_8 = arith.constant 0 : index
    %7 = vector.load %arg5[%c0_6, %c0_7, %c0_8] : memref<1x5x256xf32, #tpu.memory_space<vmem>>, vector<1x5x256xf32>
    %8 = vector.shape_cast %7 : vector<1x5x256xf32> to vector<5x256xf32>
    %9 = vector.shape_cast %6 : vector<5x256xf32> to vector<1x5x256xf32>
    tpu.vector_store %arg5[%c0_6, %c0_7, %c0_8], %9 {strides = array<i32>} : memref<1x5x256xf32, #tpu.memory_space<vmem>>, vector<1x5x256xf32>,
    return
  }
  func.func @transform_0(%arg0: i32, %arg1: i32) -> (i32, i32, i32) {
    %c0_i32 = arith.constant 0 : i32
    %c0_i32_0 = arith.constant 0 : i32
    return %arg0, %c0_i32, %arg1 : i32, i32, i32
  }
  func.func @transform_1(%arg0: i32, %arg1: i32) -> (i32, i32) {
    %c0_i32 = arith.constant 0 : i32
    %c0_i32_0 = arith.constant 0 : i32
    %c0_i32_1 = arith.constant 0 : i32
    return %c0_i32, %c0_i32_0 : i32, i32
  }
  func.func @transform_2(%arg0: i32, %arg1: i32) -> (i32, i32) {
    %c0_i32 = arith.constant 0 : i32
    %c0_i32_0 = arith.constant 0 : i32
    %c0_i32_1 = arith.constant 0 : i32
    return %c0_i32, %c0_i32_0 : i32, i32
  }
  func.func @transform_3(%arg0: i32, %arg1: i32) -> (i32, i32, i32) {
    %c0_i32 = arith.constant 0 : i32
    %c0_i32_0 = arith.constant 0 : i32
    return %arg0, %c0_i32, %arg1 : i32, i32, i32
  }
}

</mosaic_0001>

<bundles_post_ra>
// kernel: tpu_custom_call.1
= control target key start
LH: loop header
LB: loop body
LE: loop exit
PB: predicated region body
PF: predicated region fallthrough
CT: control target
= control target key end

     0   :  { %8 = vsyncpa [#allocation3], 0  ;;  %s727_s0 = inlined_call_operand.hbm [shape: f32[2,32,256], index: 0, kind: input, shape index: {}]   ;;  %s728_s1 = inlined_call_operand.vmem [shape: f32[5,32], index: 1, kind: input, shape index: {}]   ;;  %s729_s2 = inlined_call_operand.vmem [shape: f32[5,1], index: 2, kind: input, shape index: {}]   ;;  %s730_s3 = inlined_call_operand.vmem [shape: f32[2,5,256], index: 3, kind: output, shape index: {}]  }
   0x1   :  { %10 = vsyncpa [#allocation3 + $0x1], 0  ;;  %s597_s12 = smov 0   ;;  %s599_s13 = smov 0  }
   0x2   :  { %s601_s14 = smov 0   ;;  %s603_s15 = smov 0  }
   0x3   :  { %s605_s16 = smov 0   ;;  %s607_s17 = smov 0  }
   0x4 LB: > { %s406_s18 = sadd.s32 4294967295, %s570_s17   ;;  %s28_s19 = sadd.s32 1, %s566_s16  ;;  %s570_s17 = sphi %s607_s17, %s16_s17   ;;  %s566_s16 = sphi %s605_s16, %s738_s16   ;;  %s562_s15 = sphi %s603_s15, %s737_s15   ;;  %s558_s14 = sphi %s601_s14, %s736_s14   ;;  %s554_s13 = sphi %s599_s13, %s735_s13   ;;  %s550_s12 = sphi %s597_s12, %s734_s12  }
   0x5   : > { %p30_p0 = scmp.ge.s32.totalorder %s28_s19, 2  ;;  %s37_s20 = sadd.s32 1, %s558_s14 }
   0x6   : > { %p44_p1 = scmp.ne.s32.totalorder %s558_s14, %s554_s13  ;;  %p45_p2 = scmp.eq.s32.totalorder %s570_s17, 0 }
   0x7   : > { %s740_s19 = smov (%p30_p0, %s28_s19), 0  ;;  %p50_p4 = scmp.ne.s32.totalorder %s554_s13, %s550_s12 }
   0x8   : > { %p633_p3 = por %p45_p2, %p44_p1  ;;  %s32_s22 = ssub.s32 %s566_s16, %s740_s19 }
   0x9   : > { %p51_p5 = scmp.eq.s32.totalorder %s406_s18, 0  ;;  %p35_p6 = scmp.eq.s32.totalorder %s32_s22, 0 }
   0xa   : > { %p436_p8 = scmp.lt.s32.totalorder %s570_s17, 2  ;;  %s150_s25 = sand.u32 1, %s558_s14  }
   0xb   : > { %p640_p7 = por %p51_p5, %p50_p4  ;;  %s420_s26 = sshll.u32 %s566_s16, 10 }
   0xc   : > { %s646_s24 = scalar_select %p35_p6, %s558_s14, %s37_s20  }
   0xd   : > { %s410_s27 = sshll.u32 %s150_s25, 6  ;;  %s653_s30 = scalar_lea.hbm %s727_s0, %s420_s26 }
   0xe   : > { %s154_s4 = scalar_lea.vmem [#allocation2], %s410_s27  ;;  %p657_p9 = pnand %p436_p8, %p633_p3 }
   0xf   : > { %s163_s5 = sshll.u32 %s154_s4, 4  ;;  %s663_s7 = scalar_lea.sflag [#allocation3], %s150_s25  ;;  %s661_s5 = int_to_ptr.vmem [resolvable:$true] %s163_s5 }
  0x10   : > { %s490_s8 = scalar_lea.hbm %s653_s30, 1024  ;;  %p492_p11 = pneg %p657_p9 }
  0x11   : > { %p491_p10 = scmp.ne.s32.totalorder %s653_s30, %s490_s8  ;;  %s495_s11 = scalar_lea.hbm %s727_s0, 2048 }
  0x12   : > { %p496_p0 = scmp.lt.u32.totalorder %s653_s30, %s727_s0  ;;  %p497_p1 = scmp.lt.u32.totalorder %s495_s11, %s490_s8 }
  0x13   : > { %p493_p12 = pnand %p492_p11, %p491_p10  ;;  %p499_p3 = scmp.lt.u32.totalorder %s490_s8, %s653_s30 }
  0x14   : > { %p498_p2 = por %p497_p1, %p496_p0 }
  0x15   : > { %p494_p13 = pneg %p493_p12 }
  0x16   : > { %p500_p4 = por %p499_p3, %p498_p2 }
  0x18   : > { %p501_p5 = pnand %p500_p4, %p494_p13 }
  0x1a   : > { %504 = shalt.err (!%p501_p5)
}
  0x1b   : > { %s505_s20 = scalar_lea.vmem %s661_s5, 1024  ;;  %s572_s21 = smov [#allocation2]  }
  0x1c   : > { %p506_p6 = scmp.ne.s32.totalorder %s661_s5, %s505_s20  ;;  %s510_s22 = sshll.u32 %s572_s21, 4  ;;  %s511_s22 = int_to_ptr.vmem [resolvable:$false] %s510_s22 }
  0x1d   : > { %s512_s25 = scalar_lea.vmem %s511_s22, 2048  ;;  %p513_p12 = scmp.lt.s32.totalorder %s661_s5, %s511_s22 }
  0x1e   : > { %p508_p8 = pnand %p506_p6, %p492_p11  ;;  %p514_p0 = scmp.lt.s32.totalorder %s512_s25, %s505_s20 }
  0x20   : > { %p509_p10 = pneg %p508_p8  ;;  %p515_p1 = por %p514_p0, %p513_p12 }
  0x22   : > { %p516_p2 = pnand %p515_p1, %p509_p10 }
  0x24   : > { %519 = shalt.err (!%p516_p2)
}
  0x25   : > { %s573_s26 = smov 256   ;;  %s574_s27 = smov 16  }
  0x26   : > { %435 = dma.hbm_to_vmem [thread:$0]  (!%p657_p9), %s653_s30, 1024, %s661_s5, %s663_s7, %s573_s26, %s573_s26, %s574_s27  }
  0x27   : > { %p413_p11 = scmp.ge.s32.totalorder %s570_s17, 1  ;;  %p171_p13 = scmp.lt.s32.totalorder %s570_s17, 3 }
  0x29   : > { %p172_p3 = pnand %p413_p11, %p171_p13 }
  0x2a   : > { %s177_s28 = sand.u32 (!%p172_p3), 1, %s554_s13  }
  0x2b   : > { %175 = sbr.rel (%p172_p3) target bundleno = 278 (0x116), region = 32  ;;  %s414_s29 = sshll.u32 (!%p172_p3), %s177_s28, 6 }
  0x2c   : > { %s178_s4 = scalar_lea.sflag (!%p172_p3), [#allocation3], %s177_s28  ;;  %s181_s8 = scalar_lea.vmem (!%p172_p3), [#allocation2], %s414_s29 }
  0x32   : > { %545 = dma.done.wait (%p640_p7), %s178_s4, 1024  }
  0x33   : > { %547 = vsyncadd (%p640_p7), %s178_s4, 4294966272  ;;  %v575_v0 = vmov 0.0   ;;  %v576_v1 = vmov 0   ;;  %v220_v2 = vld [vmem:[%s181_s8 + $0x8] sm:$0xff]  ;;  %v222_v3 = vld [vmem:[%s181_s8 + $0x18] sm:$0xff]  ;;  %vm234_vm0 = vcmask 261120  }
  0x34   : > { %302 = vmatprep.mubr.f32.mxu0 %v575_v0  ;;  %489 = vset.pattern.permute.xlu0 %v576_v1  ;;  %v219_v4 = vld [vmem:[%s181_s8] sm:$0xff]  ;;  %v422_v5 = vpack.c.bf16 %v222_v3, %v220_v2  ;;  %v221_v6 = vld [vmem:[%s181_s8 + $0x10] sm:$0xff]  ;;  %v224_v7 = vld [vmem:[%s181_s8 + $0x28] sm:$0xff]  ;;  %p210_p7 = scmp.lt.s32.totalorder %s562_s15, 1 }
  0x35   : > { %v226_v8 = vld [vmem:[%s181_s8 + $0x38] sm:$0xff]  ;;  %v424_v9 = vpack.c.bf16 %v221_v6, %v219_v4  ;;  %v223_v11 = vld [vmem:[%s181_s8 + $0x20] sm:$0xff]  ;;  %v225_v12 = vld [vmem:[%s181_s8 + $0x30] sm:$0xff] }
  0x36   : > { %v426_v10 = vpack.c.bf16 %v226_v8, %v224_v7  ;;  %423 = vmatprep.subr.bf16.mxu0 %v422_v5  ;;  %v228_v13 = vld [vmem:[%s729_s2] sm:$0x1f]  ;;  %v428_v14 = vpack.c.bf16 %v225_v12, %v223_v11  ;;  %s742_s15 = smov (!%p210_p7, %s562_s15), 1 }
  0x37   : > { %425 = vmatpush1.bf16.msra.mxu0 %v424_v9  ;;  %231 = vperm.xlu0 %489, %v228_v13   ;;  %v227_v15 = vld [vmem:[%s728_s1] sm:$0x1f]  ;;  %s421_s7 = sshll.u32 %s742_s15, 4 }
  0x38   : > { %427 = vmatprep.subr.bf16.mxu0 %v426_v10  ;;  %s217_s11 = scalar_lea.vmem %s730_s3, %s421_s7 }
  0x3b   : > { %429 = vmatpush1.bf16.msra.mxu0 %v428_v14 }
  0x3e   : > { %417 = vmatmul.mubr.msk.f32.vlgmr.msra.gmra.mrb[0].mxu0 %vm234_vm0, %v227_v15 }
  0xb6   : > { %v232_v16 = vpop.permute.xlu0 %231 }
 0x111   : > { %v304_v17 = vpop.f32.mrb[0].mxu0 }
 0x112   : > { %v305_v18 = vadd.f32 %v304_v17, %v232_v16  ;;  %v306_v19 = vpop.f32.mrb[1].mxu0 }
 0x113   : > { %v307_v20 = vadd.f32 %v306_v19, %v232_v16 }
 0x114   : > { %309 = vst [vmem:[%s217_s11] sm:$0x1f] %v305_v18 }
 0x115   : > { %310 = vst [vmem:[%s217_s11 + $0x8] sm:$0x1f] %v307_v20 }
 0x116 PF: > { %s16_s17 = sadd.s32 1, %s570_s17   ;;  %s734_s12 = smov %s554_s13 }
 0x117   : > { %p13_p9 = scmp.ge.s32.totalorder %s16_s17, 4   ;;  %s735_s13 = smov %s558_s14 }
 0x118   : > { %s736_s14 = smov %s646_s24  ;;  %s737_s15 = smov %s566_s16 }
 0x119   : > { %s738_s16 = smov %s740_s19  ;;  %15 = sbr.rel (!%p13_p9) target bundleno = 4 (0x4), region = 72 }
 0x120   :  { %341 = vsyncpa [#allocation3], 1 }
 0x121   :  { %343 = vsyncpa [#allocation3 + $0x1], 1 }

</bundles_post_ra>
